<compile_context>
chip_gen: v5e
topology: v5e:2x2
jax: 0.10.0
libtpu: 0.0.40
codegen_flags: <defaults>
</compile_context>

<pallas_src>
import functools
import math

import jax
import jax.numpy as jnp
import numpy as np
from jax.experimental import pallas as pl
from jax.experimental.pallas import tpu as pltpu


def _round_up(a: int, b: int) -> int:
    return (a + b - 1) // b * b


def _tpu_defaults():
    """(tb_max, exp_dtype) tuned per TPU generation, with a safe fallback."""
    try:
        kind = jax.devices()[0].device_kind.lower()
    except Exception:
        kind = ""
    if any(t in kind for t in ("v6", "v7", "tpu7")):
        # 256-wide MXU; EUP has a bf16 path -> bf16 exp for the B_avg partial.
        return 256, jnp.bfloat16
    # v5e / v4: 128x128 MXU, no bf16 EUP.
    return 128, jnp.float32


# --------------------------------------------------------------------------- #
# Prologue kernel: row-wise L2 normalization (f32 in, bf16 out), done ONCE.    #
# --------------------------------------------------------------------------- #
def _row_normalize_kernel(v_ref, o_ref):
    v = v_ref[...]                                           # (TR, F) f32
    ssq = jnp.sum(v * v, axis=-1, keepdims=True)
    # F.normalize: v / max(||v||, 1e-12) == v * rsqrt(max(||v||^2, 1e-24))
    o_ref[...] = (v * jax.lax.rsqrt(jnp.maximum(ssq, 1e-24))).astype(o_ref.dtype)


def _row_normalize(v):
    rows, feat = v.shape
    tile_rows = math.gcd(rows, 128)      # <=128-row tiles bound prologue VMEM
    # TODO(synk): for very large F (>~16K) switch to a two-pass (ssq, scale)
    # normalization so the (tile_rows, F) f32 block stays within VMEM.
    return pl.pallas_call(
        _row_normalize_kernel,
        out_shape=jax.ShapeDtypeStruct((rows, feat), jnp.bfloat16),
        grid=(rows // tile_rows,),
        in_specs=[pl.BlockSpec((tile_rows, feat), lambda i: (i, 0))],
        out_specs=pl.BlockSpec((tile_rows, feat), lambda i: (i, 0)),
        compiler_params=pltpu.CompilerParams(
            dimension_semantics=("parallel",),
            vmem_limit_bytes=32 * 1024 * 1024),
    )(v)


# --------------------------------------------------------------------------- #
# Main kernel: one (TB, TC) tile of raw logits + lane-dense exp-sum partial.   #
# --------------------------------------------------------------------------- #
def _adacos_tile_kernel(xn_ref, wn_ref, logits_ref, bsum_ref, *,
                        rows_valid, cols_valid, mask_rows, mask_cols,
                        exp_dtype):
    # MXU matmul: bf16 inputs, f32 accumulation, W consumed in its native
    # (C, F) layout (contract the last dim of both operands -> no transpose).
    logits = jax.lax.dot_general(
        xn_ref[...], wn_ref[...],
        dimension_numbers=(((1,), (1,)), ((), ())),
        preferred_element_type=jnp.float32)                  # (TB, TC) f32
    logits_ref[...] = logits

    tb, tc = logits.shape
    # Partial sum over all *valid* positions of exp(logits).  The B target
    # terms are subtracted in XLA (B-element gather), and the adaptive scale s
    # multiplies OUTSIDE the kernel, so the kernel depends on neither.
    e = jnp.exp(logits.astype(exp_dtype)).astype(jnp.float32)
    if mask_rows:   # grid = (class tiles, batch tiles) -> rows come from axis 1
        row = (pl.program_id(1) * tb
               + jax.lax.broadcasted_iota(jnp.int32, (tb, 1), 0))
        e = e * (row < rows_valid).astype(jnp.float32)       # lane broadcast
    if mask_cols:
        col = (pl.program_id(0) * tc
               + jax.lax.broadcasted_iota(jnp.int32, (1, tc), 1))
        e = e * (col < cols_valid).astype(jnp.float32)       # sublane broadcast
    partial = jnp.sum(jnp.sum(e, axis=1, keepdims=True), axis=0, keepdims=True)
    # Lane-dense unmasked (8,128) store of the per-tile partial (reduced in XLA).
    bsum_ref[...] = jnp.broadcast_to(partial, (8, 128))


# --------------------------------------------------------------------------- #
# Wrapper.                                                                     #
# --------------------------------------------------------------------------- #
def adacos_forward(x, W, label, m=0.5, s=None, *,
                   tb_max=None, tc_max=512, exp_dtype=None):
    B, F = x.shape
    C, F2 = W.shape
    assert F == F2
    if s is None:
        s = math.sqrt(2.0) * math.log(C - 1)                 # self.s at __init__
    s = jnp.asarray(s, jnp.float32)

    dflt_tb, dflt_exp = _tpu_defaults()
    tb_max = dflt_tb if tb_max is None else tb_max
    exp_dtype = dflt_exp if exp_dtype is None else exp_dtype

    tb = min(tb_max, _round_up(B, 16))                       # sublane/bf16-pack friendly
    tc = min(tc_max, _round_up(C, 128))                      # lane-dense output tiles
    b_pad = _round_up(B, tb)
    c_pad = _round_up(C, tc)
    f_pad = _round_up(F, 128)
    gb, gc = b_pad // tb, c_pad // tc

    x_p = jnp.pad(x.astype(jnp.float32), ((0, b_pad - B), (0, f_pad - F)))
    w_p = jnp.pad(W.astype(jnp.float32), ((0, c_pad - C), (0, f_pad - F)))
    label = label.astype(jnp.int32)

    xn = _row_normalize(x_p)            # (b_pad, f_pad) bf16
    wn = _row_normalize(w_p)            # (c_pad, f_pad) bf16, normalized once

    kernel = functools.partial(
        _adacos_tile_kernel,
        rows_valid=B, cols_valid=C,
        mask_rows=(b_pad != B), mask_cols=(c_pad != C),
        exp_dtype=exp_dtype)

    # Rough double-buffered VMEM budget; capped at 48 MiB so it is valid on
    # v7x (64 MiB physical) as well as v5e/v6e (128 MiB).
    vmem_need = 2 * 2 * (tb + tc) * f_pad + 2 * 4 * (tb * tc + 8 * 128)
    vmem_limit = min(48 << 20, max(32 << 20, int(vmem_need) + (4 << 20)))
    # TODO(synk): for very large F (>~16K) add an "arbitrary" K grid axis over
    # the feature dim with a (tb, tc) f32 VMEM accumulator, so the tile budget
    # is independent of F (needed to fit v7x's 64 MiB VMEM).

    # Grid = (class tiles OUTER, batch tiles INNER): W blocks are fetched once,
    # x tiles are the (much smaller) streamed operand.
    logits_full, bsum = pl.pallas_call(
        kernel,
        out_shape=(jax.ShapeDtypeStruct((b_pad, c_pad), jnp.float32),
                   jax.ShapeDtypeStruct((gb * 8, gc * 128), jnp.float32)),
        grid=(gc, gb),
        in_specs=[pl.BlockSpec((tb, f_pad), lambda j, i: (i, 0)),
                  pl.BlockSpec((tc, f_pad), lambda j, i: (j, 0))],
        out_specs=(pl.BlockSpec((tb, tc), lambda j, i: (i, j)),
                   pl.BlockSpec((8, 128), lambda j, i: (i, j))),
        compiler_params=pltpu.CompilerParams(
            dimension_semantics=("parallel", "parallel"),
            vmem_limit_bytes=vmem_limit),
    )(xn, wn)

    logits = logits_full[:B, :C]

    # ---- margin blend: only the B target entries differ from the raw logits,
    # so compute them in XLA from a B-element gather of the kernel's output.
    cos_m, sin_m = math.cos(m), math.sin(m)
    rows = jnp.arange(B)
    tgt_raw = logits[rows, label]                                   # (B,)
    c_t = jnp.clip(tgt_raw, -1.0 + 1e-7, 1.0 - 1e-7)
    # cos(arccos(c) + m) == c*cos(m) - sqrt(1 - c^2)*sin(m): exact identity.
    tgt_margin = c_t * cos_m - jnp.sqrt(1.0 - c_t * c_t) * sin_m

    # ---- tiny, data-dependent scalar s-update (plain JAX / XLA) ---- #
    sum_all = jnp.sum(bsum[::8, ::128])             # one value per tile
    b_avg = s * (sum_all - jnp.sum(jnp.exp(tgt_raw))) / B

    # TODO(synk): torch.median over all B*C thetas is a global order statistic;
    # there is no clean Pallas TPU kernel for it, so it stays as an XLA sort.
    # arccos is monotone decreasing, so the lower median of theta is arccos of
    # one order statistic of the sorted clipped logits (one arccos, not B*C).
    n = B * C
    clipped = jnp.clip(logits, -1.0 + 1e-7, 1.0 - 1e-7)
    sorted_logits = jnp.sort(clipped.reshape(-1))
    theta_med = jnp.arccos(sorted_logits[n - 1 - (n - 1) // 2])
    s_new = jnp.log(b_avg) / jnp.cos(
        jnp.minimum(jnp.float32(math.pi / 4.0), theta_med))

    # Final scale + B-element margin scatter (fused by XLA into one pass).
    # A consumer-side fusion of `* s_new` would save one more B*C round trip.
    output = (logits * s_new).at[rows, label].set(tgt_margin * s_new)
    return output, s_new


# --------------------------------------------------------------------------- #
# Pure-JAX replica of the PyTorch forward (correctness reference).             #
# --------------------------------------------------------------------------- #
def adacos_reference(x, W, label, m=0.5, s=None):
    C = W.shape[0]
    if s is None:
        s = math.sqrt(2.0) * math.log(C - 1)
    xn = x / jnp.maximum(jnp.linalg.norm(x, axis=1, keepdims=True), 1e-12)
    wn = W / jnp.maximum(jnp.linalg.norm(W, axis=1, keepdims=True), 1e-12)
    logits = jnp.dot(xn, wn.T, precision=jax.lax.Precision.HIGHEST)
    theta = jnp.arccos(jnp.clip(logits, -1.0 + 1e-7, 1.0 - 1e-7))
    target_logits = jnp.cos(theta + m)
    one_hot = jax.nn.one_hot(label, C, dtype=jnp.float32)
    output = logits * (1.0 - one_hot) + target_logits * one_hot
    b_avg = jnp.sum(jnp.where(one_hot < 1.0, s * jnp.exp(logits), 0.0)) / x.shape[0]
    n = theta.size
    theta_med = jnp.sort(theta.reshape(-1))[(n - 1) // 2]
    s_new = jnp.log(b_avg) / jnp.cos(jnp.minimum(jnp.float32(math.pi / 4.0), theta_med))
    return output * s_new, s_new


if __name__ == "__main__":
    # Small shapes; deliberately non-multiples of (16, 128) to exercise the
    # padding / masking paths of the tiled kernel.
    B, num_features, num_classes = 10, 40, 200
    key = jax.random.PRNGKey(0)
    kx, kw, kl = jax.random.split(key, 3)

    x = jax.random.normal(kx, (B, num_features), dtype=jnp.float32)
    # xavier_uniform_ on W of shape (num_classes, num_features)
    bound = math.sqrt(6.0 / (num_features + num_classes))
    W = jax.random.uniform(kw, (num_classes, num_features), dtype=jnp.float32,
                           minval=-bound, maxval=bound)
    label = jax.random.randint(kl, (B,), 0, num_classes, dtype=jnp.int32)

    out, s_new = adacos_forward(x, W, label)
    out = jax.block_until_ready(out)

    ref_out, ref_s = adacos_reference(x, W, label)
    assert out.shape == (B, num_classes)
    assert bool(jnp.all(jnp.isfinite(out)))
    # bf16 MXU inputs (f32 accumulation) and bf16 exp on v6e/v7x -> slightly
    # looser tolerance than the fp32-HIGHEST reference; |output| is O(s) ~ 10.
    np.testing.assert_allclose(np.asarray(out), np.asarray(ref_out),
                               rtol=2e-2, atol=6e-2)
    np.testing.assert_allclose(float(s_new), float(ref_s), rtol=5e-3)
    print("KERNEL_OK")
</pallas_src>

<mosaic_0001>
module attributes {stable_mosaic.version = 11 : i64} {
  func.func @_row_normalize_kernel(%arg0: i32, %arg1: memref<16x128xf32, #tpu.memory_space<vmem>>, %arg2: memref<16x128xbf16, #tpu.memory_space<vmem>>) attributes {dimension_semantics = [#tpu.dimension_semantics<parallel>], iteration_bounds = array<i64: 1>, scalar_prefetch = 0 : i64, scratch_operands = 0 : i64, tpu.core_type = #tpu.core_type<tc>, window_params = [{transform_indices = @transform_0, window_bounds = array<i64: 16, 128>}, {transform_indices = @transform_1, window_bounds = array<i64: 16, 128>}]} {
    %c0 = arith.constant 0 : index
    %c0_0 = arith.constant 0 : index
    %0 = vector.load %arg1[%c0, %c0_0] : memref<16x128xf32, #tpu.memory_space<vmem>>, vector<16x128xf32>
    %1 = arith.mulf %0, %0 : vector<16x128xf32>
    %cst = arith.constant dense<0.000000e+00> : vector<16xf32>
    %2 = vector.multi_reduction <add>, %1, %cst [1] : vector<16x128xf32> to vector<16xf32>
    %3 = vector.shape_cast %2 : vector<16xf32> to vector<16x1xf32>
    %cst_1 = arith.constant 1.000000e-24 : f32
    %4 = vector.broadcast %cst_1 : f32 to vector<16x1xf32>
    %5 = arith.maximumf %3, %4 : vector<16x1xf32>
    %6 = math.rsqrt %5 : vector<16x1xf32>
    %7 = vector.broadcast %6 : vector<16x1xf32> to vector<16x128xf32>
    %8 = arith.mulf %0, %7 : vector<16x128xf32>
    %9 = arith.truncf %8 : vector<16x128xf32> to vector<16x128xbf16>
    %c0_2 = arith.constant 0 : index
    %c0_3 = arith.constant 0 : index
    %10 = vector.load %arg2[%c0_2, %c0_3] : memref<16x128xbf16, #tpu.memory_space<vmem>>, vector<16x128xbf16>
    tpu.vector_store %arg2[%c0_2, %c0_3], %9 {strides = array<i32>} : memref<16x128xbf16, #tpu.memory_space<vmem>>, vector<16x128xbf16>,
    return
  }
  func.func @transform_0(%arg0: i32) -> (i32, i32) {
    %c0_i32 = arith.constant 0 : i32
    %c0_i32_0 = arith.constant 0 : i32
    return %arg0, %c0_i32 : i32, i32
  }
  func.func @transform_1(%arg0: i32) -> (i32, i32) {
    %c0_i32 = arith.constant 0 : i32
    %c0_i32_0 = arith.constant 0 : i32
    return %arg0, %c0_i32 : i32, i32
  }
}

</mosaic_0001>

<bundles_post_ra>
// kernel: tpu_custom_call.1
= control target key start
LH: loop header
LB: loop body
LE: loop exit
PB: predicated region body
PF: predicated region fallthrough
CT: control target
= control target key end

     0   :  { %6 = vsyncpa [#allocation3], 0  ;;  %s169_s0 = inlined_call_operand.hbm [shape: f32[16,128], index: 0, kind: input, shape index: {}]   ;;  %s170_s1 = inlined_call_operand.hbm [shape: bf16[16,128], index: 1, kind: output, shape index: {}]  }
   0x1   :  { %7 = vsyncpa [#allocation4], 0  ;;  %s12_s8 = sshll.u32 %s169_s0, 4  ;;  %s147_s9 = smov [#allocation2]   ;;  %s13_s8 = int_to_ptr.hbm [resolvable:$true] %s12_s8 }
   0x2   :  { %s14_s10 = sshll.u32 %s147_s9, 4  ;;  %s148_s11 = smov 128   ;;  %s15_s10 = int_to_ptr.vmem [resolvable:$true] %s14_s10 }
   0x3   :  { %s149_s12 = smov 8  }
   0x4   :  { %20 = dma.hbm_to_vmem [thread:$0]  %s13_s8, 256, %s15_s10, [#allocation3], %s148_s11, %s148_s11, %s149_s12  }
   0x5   :  { %143 = dma.done.wait [#allocation3], 256  }
   0x6   :  { %144 = vsyncadd [#allocation3], 4294967040  ;;  %v25_v0 = vld [vmem:[#allocation2] sm:$0xff]  ;;  %v26_v2 = vld [vmem:[#allocation2 + $0x8] sm:$0xff]  ;;  %s150_s0 = smov [#allocation5]   ;;  %s67_s16 = sshll.u32 %s170_s1, 4  ;;  %s68_s16 = int_to_ptr.hbm [resolvable:$true] %s67_s16 }
   0x7   :  { %v27_v1 = vmul.f32 %v25_v0, %v25_v0  ;;  %v28_v3 = vmul.f32 %v26_v2, %v26_v2  ;;  %s65_s13 = sshll.u32 %s150_s0, 4  ;;  %s151_s17 = smov 64   ;;  %s66_s13 = int_to_ptr.vmem [resolvable:$true] %s65_s13 }
   0x8   :  { %s152_s18 = smov 4  }
   0x9   :  { %29 = vadd.xlane.f32.xlu0 %v27_v1 }
  0x11   :  { %31 = vadd.xlane.f32.xlu0 %v28_v3 }
  0x7c   :  { %v30_v4 = vpop.xlane.xlu0 %29 }
  0x7d   :  { %v33_v5 = vmax.f32 %v30_v4, 1e-24 }
  0x7f   :  { %91 = vrsqrt.f32 %v33_v5  ;;  %vm41_vm1 = vweird.f32 %v33_v5 }
  0x84   :  { %v32_v6 = vpop.xlane.xlu0 %31 }
  0x85   :  { %v92_v7 = vpop.eup %91  ;;  %v34_v8 = vmax.f32 %v32_v6, 1e-24 }
  0x86   :  { %v36_v9 = vmul.f32 %v92_v7, %v33_v5  ;;  %vm42_vm0 = vweird.f32 %v92_v7 }
  0x87   :  { %93 = vrsqrt.f32 %v34_v8  ;;  %vm43_vm3 = vmor %vm41_vm1, %vm42_vm0  ;;  %vm51_vm4 = vweird.f32 %v34_v8 }
  0x88   :  { %v37_v10 = vmul.f32 %v92_v7, %v36_v9 }
  0x8a   :  { %v38_v11 = vmul.f32 0.5, %v37_v10 }
  0x8c   :  { %v39_v13 = vsub.f32 1.5, %v38_v11 }
  0x8d   :  { %v94_v12 = vpop.eup %93 }
  0x8e   :  { %v46_v14 = vmul.f32 %v94_v12, %v34_v8  ;;  %v40_v16 = vmul.f32 %v92_v7, %v39_v13  ;;  %vm52_vm2 = vweird.f32 %v94_v12 }
  0x8f   :  { %vm53_vm5 = vmor %vm51_vm4, %vm52_vm2 }
  0x90   :  { %v47_v15 = vmul.f32 %v94_v12, %v46_v14  ;;  %v44_v19 = vsel %vm43_vm3, %v92_v7, %v40_v16 }
  0x91   :  { %v55_v22 = vmul.f32 %v44_v19, %v25_v0 }
  0x92   :  { %v48_v17 = vmul.f32 0.5, %v47_v15 }
  0x94   :  { %v49_v18 = vsub.f32 1.5, %v48_v17 }
  0x96   :  { %v50_v20 = vmul.f32 %v94_v12, %v49_v18 }
  0x98   :  { %v54_v21 = vsel %vm53_vm5, %v94_v12, %v50_v20 }
  0x99   :  { %v56_v23 = vmul.f32 %v54_v21, %v26_v2 }
  0x9b   :  { %v83_v24 = vpack.c.bf16 %v56_v23, %v55_v22 }
  0x9d   :  { %84 = vst [vmem:[#allocation5] sm:$0xff] %v83_v24  }
  0x9e   :  { %73 = dma.vmem_to_hbm [thread:$0]  %s66_s13, 128, %s68_s16, [#allocation4], %s151_s17, %s151_s17, %s152_s18  }
  0x9f   :  { %145 = dma.done.wait [#allocation4], 128  }
  0xa0   :  { %146 = vsyncadd [#allocation4], 4294967168 }
  0xa1   :  { %78 = vsyncpa [#allocation3], 1 }
  0xa2   :  { %79 = vsyncpa [#allocation4], 1 }

</bundles_post_ra>
